<compile_context>
chip_gen: v5e
topology: v5e:2x2
jax: 0.10.0
libtpu: 0.0.40
codegen_flags: <defaults>
</compile_context>

<pallas_src>
import jax
import jax.numpy as jnp
from jax.experimental import pallas as pl
from jax.experimental.pallas import tpu as pltpu

# torch.rrelu default (training=False) -> deterministic leaky-relu with
# negative slope (lower + upper) / 2 = (1/8 + 1/3) / 2.
RRELU_SLOPE = (1.0 / 8.0 + 1.0 / 3.0) / 2.0

IN_FEATURES = 64 * 2 * 2   # 256
HIDDEN = 100
OUT_FEATURES = 10

LANE = 128
SUBLANE = 8


def _round_up(x, m):
    return (x + m - 1) // m * m


# ----------------------------------------------------------------------------
# Pallas kernel: fused fc1 + rrelu + fc2 for one row tile
# ----------------------------------------------------------------------------
def _fused_mlp_kernel(x_ref, w1_ref, b1_ref, w2_ref, b2_ref, o_ref):
    """o = rrelu(x @ w1 + b1) @ w2 + b2  (eval-mode rrelu = fixed slope)."""
    # Cast in-kernel: the VPU cast hides under the x DMA; HBM sees f32 x once.
    x = x_ref[...].astype(jnp.bfloat16)
    # First GEMM on the MXU: bf16 inputs, f32 accumulation.
    h = jnp.dot(x, w1_ref[...], preferred_element_type=jnp.float32)
    # Epilogue in f32 (bias broadcast over rows + deterministic rrelu).
    h = h + b1_ref[...]
    h = jnp.where(h >= 0.0, h, h * RRELU_SLOPE)
    # Second GEMM: feed the MXU in the weights' dtype, accumulate in f32.
    o = jnp.dot(h.astype(w2_ref.dtype), w2_ref[...],
                preferred_element_type=jnp.float32)
    # Only the 10 real output columns are stored (masked vst inside VMEM is
    # cheap; the HBM writeback is 40 B/row instead of 512 B/row).
    o_ref[...] = (o + b2_ref[...])[:, :OUT_FEATURES].astype(o_ref.dtype)


def fused_mlp(x, w1, b1, w2, b2, *, tile_m=2048):
    """x: (M, 256) f32.  w1: (256, H_pad) bf16, w2: (H_pad, N_pad) bf16,
    b1/b2: (1, H_pad)/(1, N_pad) f32.  Returns (M_pad, OUT_FEATURES) f32;
    rows M..M_pad are padding garbage and must be sliced off by the caller."""
    M, K = x.shape
    K_pad, H_pad = w1.shape
    H_pad2, N_pad = w2.shape
    assert H_pad == H_pad2 and K == K_pad  # 256 is already a lane multiple

    # Adaptive row tiling: split M into pl.cdiv(M, tile_m) near-equal tiles so
    # ragged batches (e.g. M=513) are not rounded up to a whole extra tile.
    n_tiles = pl.cdiv(M, tile_m)
    tile_m = _round_up(pl.cdiv(M, n_tiles), SUBLANE)
    M_pad = n_tiles * tile_m

    if M_pad != M:
        x = jnp.pad(x, ((0, M_pad - M), (0, 0)))

    cost = pl.CostEstimate(
        flops=2 * M_pad * (K_pad * HIDDEN + HIDDEN * OUT_FEATURES),
        transcendentals=0,
        bytes_accessed=(M_pad * K_pad * x.dtype.itemsize           # x in
                        + M_pad * OUT_FEATURES * 4                 # out
                        + w1.size * w1.dtype.itemsize
                        + b1.size * b1.dtype.itemsize
                        + w2.size * w2.dtype.itemsize
                        + b2.size * b2.dtype.itemsize))

    return pl.pallas_call(
        _fused_mlp_kernel,
        out_shape=jax.ShapeDtypeStruct((M_pad, OUT_FEATURES), jnp.float32),
        grid=(n_tiles,),
        in_specs=[
            pl.BlockSpec((tile_m, K_pad), lambda i: (i, 0)),   # row tiles stream
            pl.BlockSpec((K_pad, H_pad), lambda i: (0, 0)),    # weights resident
            pl.BlockSpec((1, H_pad), lambda i: (0, 0)),
            pl.BlockSpec((H_pad, N_pad), lambda i: (0, 0)),
            pl.BlockSpec((1, N_pad), lambda i: (0, 0)),
        ],
        out_specs=pl.BlockSpec((tile_m, OUT_FEATURES), lambda i: (i, 0)),
        compiler_params=pltpu.CompilerParams(
            dimension_semantics=("parallel",)),  # shard row tiles across TCs
        cost_estimate=cost,
    )(x, w1, b1, w2, b2)


# ----------------------------------------------------------------------------
# Parameter setup (matches nn.Linear init; pre-transposed + lane-padded)
# ----------------------------------------------------------------------------
def init_params(key, compute_dtype=jnp.bfloat16):
    k1w, k1b, k2w, k2b = jax.random.split(key, 4)

    def linear(kw, kb, in_f, out_f):
        bound = in_f ** -0.5
        w = jax.random.uniform(kw, (out_f, in_f), jnp.float32, -bound, bound)
        b = jax.random.uniform(kb, (out_f,), jnp.float32, -bound, bound)
        return w, b

    w1, b1 = linear(k1w, k1b, IN_FEATURES, HIDDEN)
    w2, b2 = linear(k2w, k2b, HIDDEN, OUT_FEATURES)

    K_pad = _round_up(IN_FEATURES, LANE)    # 256
    H_pad = _round_up(HIDDEN, LANE)         # 128
    N_pad = _round_up(OUT_FEATURES, LANE)   # 128 (only the weight tile; the
                                            # kernel output stays 10-wide)

    # Pre-transpose to (in, out) and zero-pad to lane multiples once at init:
    # padded columns/rows are numerically inert (rrelu(0) = 0, zero rows of w2
    # contribute nothing), and every MXU operand is a clean 128-lane tile.
    w1_p = jnp.zeros((K_pad, H_pad), jnp.float32).at[:IN_FEATURES, :HIDDEN].set(w1.T)
    b1_p = jnp.zeros((1, H_pad), jnp.float32).at[0, :HIDDEN].set(b1)
    w2_p = jnp.zeros((H_pad, N_pad), jnp.float32).at[:HIDDEN, :OUT_FEATURES].set(w2.T)
    b2_p = jnp.zeros((1, N_pad), jnp.float32).at[0, :OUT_FEATURES].set(b2)

    return {
        "w1": w1_p.astype(compute_dtype),   # bf16 MXU operands
        "b1": b1_p,                         # biases stay f32 (f32 epilogue)
        "w2": w2_p.astype(compute_dtype),
        "b2": b2_p,
    }


@jax.jit
def forward(params, x):
    """Equivalent of FullConnectedLayerRReLU.forward on (batch, 256) input."""
    out = fused_mlp(x, params["w1"], params["b1"], params["w2"], params["b2"])
    return out[: x.shape[0]]   # drop row padding only (columns already 10)


# TODO(synk): F.rrelu(training=True) samples a random slope per element; the
# module uses the default eval-mode behaviour, which is the fixed-slope path
# implemented here.

if __name__ == "__main__":
    key = jax.random.PRNGKey(0)
    pkey, xkey = jax.random.split(key)
    params = init_params(pkey)
    x = jax.random.normal(xkey, (2, IN_FEATURES), dtype=jnp.float32)

    out = forward(params, x)
    out = jax.block_until_ready(out)

    assert out.shape == (2, OUT_FEATURES), out.shape
    assert bool(jnp.all(jnp.isfinite(out)))

    # Loose reference check (bf16 weights/activations vs f32 math).
    w1f = params["w1"].astype(jnp.float32)
    w2f = params["w2"].astype(jnp.float32)
    h_ref = x @ w1f[:IN_FEATURES, :HIDDEN] + params["b1"][:, :HIDDEN]
    h_ref = jnp.where(h_ref >= 0.0, h_ref, h_ref * RRELU_SLOPE)
    ref = h_ref @ w2f[:HIDDEN, :OUT_FEATURES] + params["b2"][:, :OUT_FEATURES]
    assert bool(jnp.allclose(out, ref, atol=5e-2, rtol=5e-2))

    print("KERNEL_OK")
</pallas_src>

<mosaic_0001>
module attributes {stable_mosaic.version = 11 : i64} {
  func.func @_fused_mlp_kernel(%arg0: i32, %arg1: memref<8x256xf32, #tpu.memory_space<vmem>>, %arg2: memref<256x128xbf16, #tpu.memory_space<vmem>>, %arg3: memref<1x128xf32, #tpu.memory_space<vmem>>, %arg4: memref<128x128xbf16, #tpu.memory_space<vmem>>, %arg5: memref<1x128xf32, #tpu.memory_space<vmem>>, %arg6: memref<8x10xf32, #tpu.memory_space<vmem>>) attributes {dimension_semantics = [#tpu.dimension_semantics<parallel>], iteration_bounds = array<i64: 1>, scalar_prefetch = 0 : i64, scratch_operands = 0 : i64, tpu.core_type = #tpu.core_type<tc>, window_params = [{transform_indices = @transform_0, window_bounds = array<i64: 8, 256>}, {pipeline_mode = #tpu.pipeline_mode<synchronous>, transform_indices = @transform_1, window_bounds = array<i64: 256, 128>}, {pipeline_mode = #tpu.pipeline_mode<synchronous>, transform_indices = @transform_2, window_bounds = array<i64: 1, 128>}, {pipeline_mode = #tpu.pipeline_mode<synchronous>, transform_indices = @transform_3, window_bounds = array<i64: 128, 128>}, {pipeline_mode = #tpu.pipeline_mode<synchronous>, transform_indices = @transform_4, window_bounds = array<i64: 1, 128>}, {transform_indices = @transform_5, window_bounds = array<i64: 8, 10>}]} {
    %c0 = arith.constant 0 : index
    %c0_0 = arith.constant 0 : index
    %0 = vector.load %arg1[%c0, %c0_0] : memref<8x256xf32, #tpu.memory_space<vmem>>, vector<8x256xf32>
    %1 = arith.truncf %0 : vector<8x256xf32> to vector<8x256xbf16>
    %c0_1 = arith.constant 0 : index
    %c0_2 = arith.constant 0 : index
    %2 = vector.load %arg2[%c0_1, %c0_2] : memref<256x128xbf16, #tpu.memory_space<vmem>>, vector<256x128xbf16>
    %cst = arith.constant dense<0.000000e+00> : vector<8x128xf32>
    %3 = tpu.matmul %1, %2, %cst {dimension_numbers = #tpu.dot_dimension_numbers<[1], [0], [0], [1], [0, 0, 1, 1], [], []>} : vector<8x256xbf16>, vector<256x128xbf16>, vector<8x128xf32> -> vector<8x128xf32>
    %c0_3 = arith.constant 0 : index
    %c0_4 = arith.constant 0 : index
    %4 = vector.load %arg3[%c0_3, %c0_4] : memref<1x128xf32, #tpu.memory_space<vmem>>, vector<1x128xf32>
    %5 = vector.broadcast %4 : vector<1x128xf32> to vector<8x128xf32>
    %6 = arith.addf %3, %5 : vector<8x128xf32>
    %cst_5 = arith.constant 0.000000e+00 : f32
    %7 = vector.broadcast %cst_5 : f32 to vector<8x128xf32>
    %8 = arith.cmpf oge, %6, %7 : vector<8x128xf32>
    %cst_6 = arith.constant 0.229166672 : f32
    %9 = vector.broadcast %cst_6 : f32 to vector<8x128xf32>
    %10 = arith.mulf %6, %9 : vector<8x128xf32>
    %11 = arith.select %8, %6, %10 : vector<8x128xi1>, vector<8x128xf32>
    %12 = arith.truncf %11 : vector<8x128xf32> to vector<8x128xbf16>
    %c0_7 = arith.constant 0 : index
    %c0_8 = arith.constant 0 : index
    %13 = vector.load %arg4[%c0_7, %c0_8] : memref<128x128xbf16, #tpu.memory_space<vmem>>, vector<128x128xbf16>
    %cst_9 = arith.constant dense<0.000000e+00> : vector<8x128xf32>
    %14 = tpu.matmul %12, %13, %cst_9 {dimension_numbers = #tpu.dot_dimension_numbers<[1], [0], [0], [1], [0, 0, 1, 1], [], []>} : vector<8x128xbf16>, vector<128x128xbf16>, vector<8x128xf32> -> vector<8x128xf32>
    %c0_10 = arith.constant 0 : index
    %c0_11 = arith.constant 0 : index
    %15 = vector.load %arg5[%c0_10, %c0_11] : memref<1x128xf32, #tpu.memory_space<vmem>>, vector<1x128xf32>
    %16 = vector.broadcast %15 : vector<1x128xf32> to vector<8x128xf32>
    %17 = arith.addf %14, %16 : vector<8x128xf32>
    %18 = vector.extract_strided_slice %17 {offsets = [0, 0], sizes = [8, 10], strides = [1, 1]} : vector<8x128xf32> to vector<8x10xf32>
    %c0_12 = arith.constant 0 : index
    %c0_13 = arith.constant 0 : index
    %19 = vector.load %arg6[%c0_12, %c0_13] : memref<8x10xf32, #tpu.memory_space<vmem>>, vector<8x10xf32>
    tpu.vector_store %arg6[%c0_12, %c0_13], %18 {strides = array<i32>} : memref<8x10xf32, #tpu.memory_space<vmem>>, vector<8x10xf32>,
    return
  }
  func.func @transform_0(%arg0: i32) -> (i32, i32) {
    %c0_i32 = arith.constant 0 : i32
    %c0_i32_0 = arith.constant 0 : i32
    return %arg0, %c0_i32 : i32, i32
  }
  func.func @transform_1(%arg0: i32) -> (i32, i32) {
    %c0_i32 = arith.constant 0 : i32
    %c0_i32_0 = arith.constant 0 : i32
    %c0_i32_1 = arith.constant 0 : i32
    return %c0_i32, %c0_i32_0 : i32, i32
  }
  func.func @transform_2(%arg0: i32) -> (i32, i32) {
    %c0_i32 = arith.constant 0 : i32
    %c0_i32_0 = arith.constant 0 : i32
    %c0_i32_1 = arith.constant 0 : i32
    return %c0_i32, %c0_i32_0 : i32, i32
  }
  func.func @transform_3(%arg0: i32) -> (i32, i32) {
    %c0_i32 = arith.constant 0 : i32
    %c0_i32_0 = arith.constant 0 : i32
    %c0_i32_1 = arith.constant 0 : i32
    return %c0_i32, %c0_i32_0 : i32, i32
  }
  func.func @transform_4(%arg0: i32) -> (i32, i32) {
    %c0_i32 = arith.constant 0 : i32
    %c0_i32_0 = arith.constant 0 : i32
    %c0_i32_1 = arith.constant 0 : i32
    return %c0_i32, %c0_i32_0 : i32, i32
  }
  func.func @transform_5(%arg0: i32) -> (i32, i32) {
    %c0_i32 = arith.constant 0 : i32
    %c0_i32_0 = arith.constant 0 : i32
    return %arg0, %c0_i32 : i32, i32
  }
}

</mosaic_0001>

<bundles_post_ra>
// kernel: forward.1
= control target key start
LH: loop header
LB: loop body
LE: loop exit
PB: predicated region body
PF: predicated region fallthrough
CT: control target
= control target key end

     0   :  { %10 = vsyncpa [#allocation3], 0  ;;  %s540_s0 = inlined_call_operand.vmem [shape: f32[8,256], index: 0, kind: input, shape index: {}]   ;;  %s541_s1 = inlined_call_operand.hbm [shape: bf16[256,128], index: 1, kind: input, shape index: {}]   ;;  %s542_s2 = inlined_call_operand.vmem [shape: f32[1,128], index: 2, kind: input, shape index: {}]   ;;  %s543_s3 = inlined_call_operand.hbm [shape: bf16[128,128], index: 3, kind: input, shape index: {}]   ;;  %s544_s4 = inlined_call_operand.vmem [shape: f32[1,128], index: 4, kind: input, shape index: {}]   ;;  %s545_s5 = inlined_call_operand.vmem [shape: f32[8,10], index: 5, kind: output, shape index: {}]  }
   0x1   :  { %s18_s20 = sshll.u32 %s541_s1, 4  ;;  %s19_s20 = int_to_ptr.hbm [resolvable:$true] %s18_s20 }
   0x2   :  { %11 = vsyncpa [#allocation5], 0  ;;  %s485_s21 = smov [#allocation2]   ;;  %s33_s25 = sshll.u32 %s543_s3, 4  ;;  %s34_s25 = int_to_ptr.hbm [resolvable:$true] %s33_s25 }
   0x3   :  { %s20_s22 = sshll.u32 %s485_s21, 4  ;;  %s486_s26 = smov 64   ;;  %s21_s22 = int_to_ptr.vmem [resolvable:$true] %s20_s22 }
   0x4   :  { %s487_s27 = smov 4   ;;  %s488_s28 = smov [#allocation4]  }
   0x5   :  { %26 = dma.hbm_to_vmem [thread:$0]  %s19_s20, 2048, %s21_s22, [#allocation3], %s486_s26, %s486_s26, %s487_s27  }
   0x6   :  { %s35_s29 = sshll.u32 %s488_s28, 4  ;;  %s36_s29 = int_to_ptr.vmem [resolvable:$true] %s35_s29 }
   0x7   :  { %41 = dma.hbm_to_vmem [thread:$0]  %s34_s25, 1024, %s36_s29, [#allocation5], %s486_s26, %s486_s26, %s487_s27  }
   0x8   :  { %481 = dma.done.wait [#allocation3], 2048  }
   0x9   :  { %482 = vsyncadd [#allocation3], 4294965248 }
   0xa   :  { %483 = dma.done.wait [#allocation5], 1024  }
   0xb   :  { %484 = vsyncadd [#allocation5], 4294966272  ;;  %v410_v0 = vld [vmem:[#allocation2 + $0x38] sm:$0xff]  ;;  %v409_v2 = vld [vmem:[#allocation2 + $0x30] sm:$0xff]  ;;  %vm299_vm1 = vcmask 80896  }
   0xc   :  { %v418_v1 = vld [vmem:[#allocation2 + $0x78] sm:$0xff]  ;;  %188 = vmatpush.bf16.msra.mxu0 %v410_v0  ;;  %v417_v3 = vld [vmem:[#allocation2 + $0x70] sm:$0xff]  ;;  %v408_v4 = vld [vmem:[#allocation2 + $0x28] sm:$0xff] }
   0xd   :  { %201 = vmatpush.bf16.msra.mxu1 %v418_v1  ;;  %v416_v5 = vld [vmem:[#allocation2 + $0x68] sm:$0xff]  ;;  %v426_v6 = vld [vmem:[#allocation4 + $0x38] sm:$0xff]  ;;  %v425_v7 = vld [vmem:[#allocation4 + $0x30] sm:$0xff] }
   0xe   :  { %286 = vmatpush.bf16.msra.mxu2 %v426_v6  ;;  %v407_v8 = vld [vmem:[#allocation2 + $0x20] sm:$0xff]  ;;  %v424_v10 = vld [vmem:[#allocation4 + $0x28] sm:$0xff]  ;;  %v406_v11 = vld [vmem:[#allocation2 + $0x18] sm:$0xff] }
   0xf   :  { %v415_v9 = vld [vmem:[#allocation2 + $0x60] sm:$0xff]  ;;  %v414_v12 = vld [vmem:[#allocation2 + $0x58] sm:$0xff]  ;;  %v405_v14 = vld [vmem:[#allocation2 + $0x10] sm:$0xff] }
  0x10   :  { %189 = vmatpush.bf16.msra.mxu0 %v409_v2  ;;  %v423_v13 = vld [vmem:[#allocation4 + $0x20] sm:$0xff]  ;;  %v413_v15 = vld [vmem:[#allocation2 + $0x50] sm:$0xff]  ;;  %v422_v16 = vld [vmem:[#allocation4 + $0x18] sm:$0xff] }
  0x11   :  { %202 = vmatpush.bf16.msra.mxu1 %v417_v3  ;;  %v404_v17 = vld [vmem:[#allocation2 + $0x8] sm:$0xff]  ;;  %v421_v19 = vld [vmem:[#allocation4 + $0x10] sm:$0xff]  ;;  %v403_v20 = vld [vmem:[#allocation2] sm:$0xff] }
  0x12   :  { %287 = vmatpush.bf16.msra.mxu2 %v425_v7  ;;  %v412_v18 = vld [vmem:[#allocation2 + $0x48] sm:$0xff]  ;;  %v411_v21 = vld [vmem:[#allocation2 + $0x40] sm:$0xff] }
  0x13   :  { %v52_v22 = vld [vmem:[%s540_s0] sm:$0xff]  ;;  %v53_v23 = vld [vmem:[%s540_s0 + $0x8] sm:$0xff] }
  0x14   :  { %190 = vmatpush.bf16.msra.mxu0 %v408_v4  ;;  %v54_v24 = vpack.c.bf16 %v52_v22, %v52_v22  ;;  %v55_v25 = vpack.c.bf16 %v53_v23, %v53_v23  ;;  %v420_v26 = vld [vmem:[#allocation4 + $0x8] sm:$0xff]  ;;  %v419_v27 = vld [vmem:[#allocation4] sm:$0xff] }
  0x15   :  { %203 = vmatpush.bf16.msra.mxu1 %v416_v5  ;;  %v431_v28 = vld [vmem:[%s542_s2] ss:$0 sm:$0xff] }
  0x16   :  { %288 = vmatpush.bf16.msra.mxu2 %v424_v10  ;;  %v432_v38 = vld [vmem:[%s544_s4] ss:$0 sm:$0xff] }
  0x18   :  { %191 = vmatpush.bf16.msra.mxu0 %v407_v8 }
  0x19   :  { %204 = vmatpush.bf16.msra.mxu1 %v415_v9 }
  0x1a   :  { %289 = vmatpush.bf16.msra.mxu2 %v423_v13 }
  0x1c   :  { %192 = vmatpush.bf16.msra.mxu0 %v406_v11 }
  0x1d   :  { %205 = vmatpush.bf16.msra.mxu1 %v414_v12 }
  0x1e   :  { %290 = vmatpush.bf16.msra.mxu2 %v422_v16 }
  0x20   :  { %193 = vmatpush.bf16.msra.mxu0 %v405_v14 }
  0x21   :  { %206 = vmatpush.bf16.msra.mxu1 %v413_v15 }
  0x22   :  { %291 = vmatpush.bf16.msra.mxu2 %v421_v19 }
  0x24   :  { %194 = vmatpush.bf16.msra.mxu0 %v404_v17 }
  0x25   :  { %207 = vmatpush.bf16.msra.mxu1 %v412_v18 }
  0x26   :  { %292 = vmatpush.bf16.msra.mxu2 %v420_v26 }
  0x28   :  { %195 = vmatpush.bf16.msra.mxu0 %v403_v20 }
  0x29   :  { %208 = vmatpush.bf16.msra.mxu1 %v411_v21 }
  0x2a   :  { %293 = vmatpush.bf16.msra.mxu2 %v419_v27 }
  0x2b   :  { %196 = vmatmul.bf16.vlgmr.msra.gmra.mxu0 %v54_v24 }
  0x2c   :  { %209 = vmatmul.bf16.vlgmr.msra.gmra.mxu1 %v55_v25 }
  0xa8   :  { %v197_v29 = vpop.f32.mrf.mxu0 }
  0xa9   :  { %v210_v30 = vpop.f32.mrf.mxu1  ;;  %v198_v31 = vadd.f32 %v431_v28, %v197_v29 }
  0xab   :  { %v211_v32 = vadd.f32 %v210_v30, %v198_v31 }
  0xad   :  { %v215_v33 = vmul.f32 0.22916667, %v211_v32  ;;  %vm214_vm0 = vcmp.ge.f32.partialorder %v211_v32, 0.0 }
  0xaf   :  { %v216_v34 = vsel %vm214_vm0, %v211_v32, %v215_v33 }
  0xb0   :  { %v199_v35 = vpop.f32.mrf.mxu0  ;;  %v217_v37 = vpack.c.bf16 %v216_v34, %v216_v34 }
  0xb1   :  { %v212_v36 = vpop.f32.mrf.mxu1 }
  0xb2   :  { %294 = vmatmul.bf16.vlgmr.msra.gmra.mxu2 %v217_v37 }
 0x135   :  { %v295_v39 = vpop.f32.mrf.mxu2 }
 0x136   :  { %v296_v40 = vadd.f32 %v432_v38, %v295_v39 }
 0x138   :  { %300 = vst.msk [vmem:[%s545_s5] sm:$0xff] %vm299_vm1, %v296_v40 }
 0x13d   :  { %v297_v41 = vpop.f32.mrf.mxu2 }
 0x13e   :  { %305 = vsyncpa [#allocation3], 1 }
 0x13f   :  { %306 = vsyncpa [#allocation5], 1 }

</bundles_post_ra>
